<compile_context>
chip_gen: v6e
topology: v6e:2x2x1
jax: 0.10.0
libtpu: 0.0.40
codegen_flags: <defaults>
</compile_context>

<pallas_src>
import functools

import jax
import jax.numpy as jnp
from jax.experimental import pallas as pl
from jax.experimental.pallas import tpu as pltpu

TARGET_BLOCK_BYTES = 4 << 20  # ~4 MiB of input bytes per block per operand


def _charbonnier_partial_kernel(x_ref, y_ref, o_ref, *, eps, out_sublanes,
                                mask_last, valid_rows_last):
    block_rows, lane_w = x_ref.shape
    eps2 = jnp.float32(eps * eps)

    def body(mask_tail):
        xv = x_ref[...].astype(jnp.float32)
        yv = y_ref[...].astype(jnp.float32)
        diff = xv - yv
        # sqrt of a strictly positive argument (>= eps^2); lowers to the EUP.
        val = jnp.sqrt(diff * diff + eps2)
        if mask_tail:
            # Only the last grid block can contain garbage rows (Pallas-padded
            # region past the end of the array).  valid_rows_last is static.
            row = jax.lax.broadcasted_iota(jnp.int32, (block_rows, 1), 0)
            val = jnp.where(row < valid_rows_last, val, jnp.float32(0.0))
        if out_sublanes == 8:
            # Fold only down to 8 sublanes (pure VPU adds, full-vreg store).
            o_ref[...] = jnp.sum(val.reshape(block_rows // 8, 8, lane_w), axis=0)
        else:
            o_ref[...] = jnp.sum(val, axis=0, keepdims=True)

    if not mask_last:
        body(False)
    else:
        last = pl.num_programs(0) - 1

        @pl.when(pl.program_id(0) != last)
        def _():
            body(False)

        @pl.when(pl.program_id(0) == last)
        def _():
            body(True)


def _choose_lane_width(n):
    for w in (512, 256, 128):
        if n % w == 0:
            return w
    # Ragged size: run the kernel on the 128-aligned prefix; the <128-element
    # tail is summed in plain XLA (no jnp.pad / extra HBM pass).
    return 128


def _choose_block_rows(rows, lane_w, itemsize):
    """Pick (block_rows, num_blocks): dtype-aware size, balanced/even count."""
    gran = max(8, 32 // itemsize)  # sublane packing granularity (8 f32, 16 bf16)
    target = max(gran, (TARGET_BLOCK_BYTES // (lane_w * itemsize)) // gran * gran)
    if rows <= target:
        # Mid-size inputs: split into two equal, granularity-aligned blocks so
        # both v7x TensorCores get work; tiny inputs stay as one block.
        if rows % (2 * gran) == 0 and rows * lane_w * itemsize >= (1 << 20):
            return rows // 2, 2
        return rows, 1
    num_blocks = pl.cdiv(rows, target)
    if num_blocks % 2:
        num_blocks += 1  # even block count -> no idle/straggler TC on v7x
    block_rows = ((pl.cdiv(rows, num_blocks) + gran - 1) // gran) * gran
    return block_rows, pl.cdiv(rows, block_rows)


def charbonnier_loss(x, y, eps=1e-3):
    assert x.shape == y.shape
    eps = float(eps)
    n_total = x.size

    xf = x.reshape(-1)
    yf = y.reshape(-1)

    lane_w = _choose_lane_width(n_total)
    n_main = (n_total // lane_w) * lane_w
    rows = n_main // lane_w

    total = jnp.float32(0.0)

    if rows > 0:
        itemsize = jnp.dtype(x.dtype).itemsize
        block_rows, num_blocks = _choose_block_rows(rows, lane_w, itemsize)
        valid_rows_last = rows - (num_blocks - 1) * block_rows
        mask_last = valid_rows_last != block_rows  # static, trace-time decision
        out_sublanes = 8 if block_rows % 8 == 0 else 1

        x2 = xf[:n_main].reshape(rows, lane_w)
        y2 = yf[:n_main].reshape(rows, lane_w)

        kernel = functools.partial(
            _charbonnier_partial_kernel,
            eps=eps,
            out_sublanes=out_sublanes,
            mask_last=mask_last,
            valid_rows_last=valid_rows_last,
        )

        partials = pl.pallas_call(
            kernel,
            out_shape=jax.ShapeDtypeStruct(
                (num_blocks * out_sublanes, lane_w), jnp.float32),
            grid=(num_blocks,),
            in_specs=[
                pl.BlockSpec((block_rows, lane_w), lambda i: (i, 0)),
                pl.BlockSpec((block_rows, lane_w), lambda i: (i, 0)),
            ],
            out_specs=pl.BlockSpec((out_sublanes, lane_w), lambda i: (i, 0)),
            compiler_params=pltpu.CompilerParams(
                dimension_semantics=("parallel",),
                vmem_limit_bytes=32 * 1024 * 1024,
            ),
            cost_estimate=pl.CostEstimate(
                flops=3 * n_main,
                transcendentals=n_main,
                bytes_accessed=(2 * n_main * itemsize
                                + num_blocks * out_sublanes * lane_w * 4),
            ),
        )(x2, y2)
        total = total + jnp.sum(partials, dtype=jnp.float32)

    n_tail = n_total - n_main
    if n_tail:
        tx = xf[n_main:].astype(jnp.float32)
        ty = yf[n_main:].astype(jnp.float32)
        d = tx - ty
        total = total + jnp.sum(jnp.sqrt(d * d + jnp.float32(eps * eps)))

    return total / jnp.float32(n_total)


if __name__ == "__main__":
    key = jax.random.PRNGKey(0)
    kx, ky = jax.random.split(key)
    shape = (2, 4, 16, 16)  # NCHW, matches PyTorch input convention
    x = jax.random.normal(kx, shape, dtype=jnp.float32)
    y = jax.random.normal(ky, shape, dtype=jnp.float32)

    eps = 1e-3
    loss = charbonnier_loss(x, y, eps=eps)
    jax.block_until_ready(loss)

    # Reference check in plain JAX.
    diff = x - y
    ref = jnp.mean(jnp.sqrt(diff * diff + eps * eps))
    assert jnp.allclose(loss, ref, rtol=1e-5, atol=1e-6), (loss, ref)

    print("KERNEL_OK")
</pallas_src>

<mosaic_0001>
module attributes {stable_mosaic.version = 11 : i64} {
  func.func @_charbonnier_partial_kernel(%arg0: i32, %arg1: memref<4x512xf32, #tpu.memory_space<vmem>>, %arg2: memref<4x512xf32, #tpu.memory_space<vmem>>, %arg3: memref<1x512xf32, #tpu.memory_space<vmem>>) attributes {dimension_semantics = [#tpu.dimension_semantics<parallel>], iteration_bounds = array<i64: 1>, scalar_prefetch = 0 : i64, scratch_operands = 0 : i64, tpu.core_type = #tpu.core_type<tc>, window_params = [{transform_indices = @transform_0, window_bounds = array<i64: 4, 512>}, {transform_indices = @transform_1, window_bounds = array<i64: 4, 512>}, {transform_indices = @transform_2, window_bounds = array<i64: 1, 512>}]} {
    %c0 = arith.constant 0 : index
    %c0_0 = arith.constant 0 : index
    %0 = vector.load %arg1[%c0, %c0_0] : memref<4x512xf32, #tpu.memory_space<vmem>>, vector<4x512xf32>
    %c0_1 = arith.constant 0 : index
    %c0_2 = arith.constant 0 : index
    %1 = vector.load %arg2[%c0_1, %c0_2] : memref<4x512xf32, #tpu.memory_space<vmem>>, vector<4x512xf32>
    %2 = arith.subf %0, %1 : vector<4x512xf32>
    %3 = arith.mulf %2, %2 : vector<4x512xf32>
    %cst = arith.constant 9.99999997E-7 : f32
    %4 = vector.broadcast %cst : f32 to vector<4x512xf32>
    %5 = arith.addf %3, %4 : vector<4x512xf32>
    %6 = math.sqrt %5 : vector<4x512xf32>
    %cst_3 = arith.constant dense<0.000000e+00> : vector<512xf32>
    %7 = vector.multi_reduction <add>, %6, %cst_3 [0] : vector<4x512xf32> to vector<512xf32>
    %8 = vector.shape_cast %7 : vector<512xf32> to vector<1x512xf32>
    %c0_4 = arith.constant 0 : index
    %c0_5 = arith.constant 0 : index
    %9 = vector.load %arg3[%c0_4, %c0_5] : memref<1x512xf32, #tpu.memory_space<vmem>>, vector<1x512xf32>
    tpu.vector_store %arg3[%c0_4, %c0_5], %8 {strides = array<i32>} : memref<1x512xf32, #tpu.memory_space<vmem>>, vector<1x512xf32>,
    return
  }
  func.func @transform_0(%arg0: i32) -> (i32, i32) {
    %c0_i32 = arith.constant 0 : i32
    %c0_i32_0 = arith.constant 0 : i32
    return %arg0, %c0_i32 : i32, i32
  }
  func.func @transform_1(%arg0: i32) -> (i32, i32) {
    %c0_i32 = arith.constant 0 : i32
    %c0_i32_0 = arith.constant 0 : i32
    return %arg0, %c0_i32 : i32, i32
  }
  func.func @transform_2(%arg0: i32) -> (i32, i32) {
    %c0_i32 = arith.constant 0 : i32
    %c0_i32_0 = arith.constant 0 : i32
    return %arg0, %c0_i32 : i32, i32
  }
}

</mosaic_0001>

<bundles_post_ra>
// kernel: tpu_custom_call.1
= control target key start
LH: loop header
LB: loop body
LE: loop exit
PB: predicated region body
PF: predicated region fallthrough
CT: control target
= control target key end

     0   :  { %7 = vsyncpa [#allocation3], 0  ;;  %s247_s0 = inlined_call_operand.hbm [shape: f32[4,512], index: 0, kind: input, shape index: {}]   ;;  %s248_s1 = inlined_call_operand.hbm [shape: f32[4,512], index: 1, kind: input, shape index: {}]   ;;  %s249_s2 = inlined_call_operand.hbm [shape: f32[1,512], index: 2, kind: output, shape index: {}]  }
   0x1   :  { %8 = vsyncpa [#allocation6], 0 }
   0x2   :  { %9 = vsyncpa [#allocation4], 0  ;;  %s219_s9 = smov [#allocation2]   ;;  %s220_s11 = smov [#allocation5]  }
   0x3   :  { %s16_s10 = sshll.u32 %s219_s9, 4  ;;  %s26_s12 = sshll.u32 %s220_s11, 4  ;;  %s17_s10 = int_to_ptr.vmem [resolvable:$true] %s16_s10  ;;  %s27_s12 = int_to_ptr.vmem [resolvable:$true] %s26_s12 }
   0x4   :  { %s161_s13 = scalar_lea.vmem %s17_s10, 256  ;;  %p166_p1 = scmp.lt.s32.totalorder %s17_s10, %s17_s10 }
   0x5   :  { %p162_p0 = scmp.ne.s32.totalorder %s17_s10, %s161_s13  ;;  %p167_p2 = scmp.lt.s32.totalorder %s161_s13, %s161_s13 }
   0x7   :  { %p168_p3 = por %p167_p2, %p166_p1 }
   0x9   :  { %p169_p4 = pnand %p168_p3, %p162_p0 }
   0xb   :  { %172 = shalt.err (!%p169_p4)
}
   0xc   :  { %19 = dma.hbm_to_vmem [thread:$0]  %s247_s0, 256, %s17_s10, [#allocation3]  }
   0xd   :  { %s181_s16 = scalar_lea.vmem %s27_s12, 256  ;;  %p186_p6 = scmp.lt.s32.totalorder %s27_s12, %s27_s12 }
   0xe   :  { %p182_p5 = scmp.ne.s32.totalorder %s27_s12, %s181_s16  ;;  %p187_p7 = scmp.lt.s32.totalorder %s181_s16, %s181_s16 }
  0x10   :  { %p188_p8 = por %p187_p7, %p186_p6 }
  0x12   :  { %p189_p9 = pnand %p188_p8, %p182_p5 }
  0x14   :  { %192 = shalt.err (!%p189_p9)
}
  0x15   :  { %29 = dma.hbm_to_vmem [thread:$0]  %s248_s1, 256, %s27_s12, [#allocation6]  }
  0x16   :  { %213 = dma.done.wait [#allocation3], 256  }
  0x17   :  { %214 = vsyncadd [#allocation3], 4294967040 }
  0x18   :  { %215 = dma.done.wait [#allocation6], 256  }
  0x19   :  { %216 = vsyncadd [#allocation6], 4294967040  ;;  %v36_v0 = vld [vmem:[#allocation2] sm:$0xff]  ;;  %v37_v1 = vld [vmem:[#allocation2 + $0x8] sm:$0xff]  ;;  %vm66_vm4 = vcmask 1043456   ;;  %v104_v36 = vlaneseq  ;;  %s222_s0 = smov [#allocation7]  }
  0x1a   :  { %v38_v2 = vld [vmem:[#allocation5] sm:$0xff]  ;;  %v39_v3 = vld [vmem:[#allocation5 + $0x8] sm:$0xff]  ;;  %v221_v34 = vmov 1966171168   ;;  %s135_s1 = sshll.u32 %s222_s0, 4  ;;  %s136_s1 = int_to_ptr.vmem [resolvable:$true] %s135_s1 }
  0x1b   :  { %v40_v4 = vsub.f32 %v36_v0, %v38_v2  ;;  %v41_v5 = vsub.f32 %v37_v1, %v39_v3  ;;  %v102_v35 = vunpack.c.l.s4 %v221_v34  ;;  %v105_v46 = vshrl.u32 %v104_v36, 7  ;;  %s193_s19 = scalar_lea.vmem %s136_s1, 64  ;;  %p198_p11 = scmp.lt.s32.totalorder %s136_s1, %s136_s1 }
  0x1c   :  { %vm126_vm5 = vcmp.lt.s32.totalorder %v104_v36, 512  ;;  %p194_p10 = scmp.ne.s32.totalorder %s136_s1, %s193_s19  ;;  %p199_p12 = scmp.lt.s32.totalorder %s193_s19, %s193_s19 }
  0x1d   :  { %v42_v6 = vmul.f32 %v40_v4, %v40_v4  ;;  %v43_v7 = vmul.f32 %v41_v5, %v41_v5  ;;  %v103_v45 = vunpack.c.0.s8 %v102_v35 }
  0x1e   :  { %p200_p13 = por %p199_p12, %p198_p11 }
  0x1f   :  { %v44_v8 = vadd.f32 1e-06, %v42_v6  ;;  %v45_v9 = vadd.f32 1e-06, %v43_v7  ;;  %v106_v54 = vsub.s32 %v103_v45, %v105_v46 }
  0x20   :  { %p201_p0 = pnand %p200_p13, %p194_p10 }
  0x21   :  { %149 = vrsqrt.f32 %v44_v8  ;;  %vm48_vm0 = vcmp.eq.f32.partialorder %v44_v8, inf  ;;  %v51_v11 = vand.u32 2147483648, %v44_v8  ;;  %vm50_vm1 = vcmp.eq.f32.partialorder %v44_v8, 0.0 }
  0x22   :  { %151 = vrsqrt.f32 %v45_v9  ;;  %vm55_vm2 = vcmp.eq.f32.partialorder %v45_v9, inf  ;;  %v58_v14 = vand.u32 2147483648, %v45_v9  ;;  %vm57_vm3 = vcmp.eq.f32.partialorder %v45_v9, 0.0 }
  0x2e   :  { %v150_v10 = vpop.eup %149 }
  0x2f   :  { %v152_v12 = vpop.eup %151  ;;  %v47_v13 = vmul.f32 %v150_v10, %v44_v8 }
  0x30   :  { %v54_v15 = vmul.f32 %v152_v12, %v45_v9 }
  0x31   :  { %v49_v16 = vsel %vm48_vm0, %v44_v8, %v47_v13 }
  0x32   :  { %v52_v17 = vsel %vm50_vm1, %v51_v11, %v49_v16  ;;  %v56_v18 = vsel %vm55_vm2, %v45_v9, %v54_v15 }
  0x33   :  { %v59_v19 = vsel %vm57_vm3, %v58_v14, %v56_v18  ;;  %v62_v20 = vcombine.high %v52_v17, %v52_v17  ;;  %v67_v21 = vsel %vm66_vm4, %v52_v17, 0.0 }
  0x34   :  { %v63_v22 = vcombine.high %v59_v19, %v59_v19  ;;  %v68_v23 = vrot.slane %v67_v21, 4  ;;  %v81_v24 = vsel %vm66_vm4, %v59_v19, 0.0 }
  0x35   :  { %v74_v25 = vsel %vm66_vm4, %v62_v20, 0.0  ;;  %v82_v26 = vrot.slane %v81_v24, 4 }
  0x36   :  { %v69_v27 = vadd.f32 %v68_v23, %v67_v21  ;;  %v75_v28 = vrot.slane %v74_v25, 4  ;;  %v88_v29 = vsel %vm66_vm4, %v63_v22, 0.0 }
  0x37   :  { %v83_v30 = vadd.f32 %v82_v26, %v81_v24  ;;  %v89_v31 = vrot.slane %v88_v29, 4 }
  0x38   :  { %v70_v32 = vrot.slane %v69_v27, 2  ;;  %v76_v33 = vadd.f32 %v75_v28, %v74_v25 }
  0x39   :  { %v84_v37 = vrot.slane %v83_v30, 2  ;;  %v90_v38 = vadd.f32 %v89_v31, %v88_v29 }
  0x3a   :  { %v71_v39 = vadd.f32 %v70_v32, %v69_v27  ;;  %v77_v40 = vrot.slane %v76_v33, 2 }
  0x3b   :  { %v85_v41 = vadd.f32 %v84_v37, %v83_v30  ;;  %v91_v42 = vrot.slane %v90_v38, 2 }
  0x3c   :  { %v72_v43 = vrot.slane %v71_v39, 1  ;;  %v78_v44 = vadd.f32 %v77_v40, %v76_v33 }
  0x3d   :  { %v86_v47 = vrot.slane %v85_v41, 1  ;;  %v92_v48 = vadd.f32 %v91_v42, %v90_v38 }
  0x3e   :  { %v73_v49 = vadd.f32 %v72_v43, %v71_v39  ;;  %v79_v50 = vrot.slane %v78_v44, 1 }
  0x3f   :  { %v87_v51 = vadd.f32 %v86_v47, %v85_v41  ;;  %v93_v52 = vrot.slane %v92_v48, 1 }
  0x40   :  { %v80_v53 = vadd.f32 %v79_v50, %v78_v44 }
  0x41   :  { %v94_v55 = vadd.f32 %v93_v52, %v92_v48 }
  0x42   :  { %v99_v56 = vcombine.low %v73_v49, %v80_v53 }
  0x43   :  { %v100_v57 = vcombine.low %v87_v51, %v94_v55 }
  0x44   :  { %v107_v58 = vrot.slane %v99_v56, %v106_v54 }
  0x45   :  { %v114_v59 = vrot.slane %v100_v57, %v106_v54 }
  0x47   :  { %v115_v60 = vcombine.low %v107_v58, %v114_v59 }
  0x49   :  { %v122_v61 = vrot.slane %v115_v60, %v106_v54 }
  0x4b   :  { %128 = vst.msk [vmem:[#allocation7] sm:$0xf] %vm126_vm5, %v122_v61 }
  0x4c   :  { %204 = shalt.err (!%p201_p0)
}
  0x4d   :  { %138 = dma.vmem_to_hbm [thread:$0]  %s136_s1, 64, %s249_s2, [#allocation4]  }
  0x4e   :  { %217 = dma.done.wait [#allocation4], 64  }
  0x4f   :  { %218 = vsyncadd [#allocation4], 4294967232 }
  0x50   :  { %142 = vsyncpa [#allocation3], 1 }
  0x51   :  { %143 = vsyncpa [#allocation6], 1 }
  0x52   :  { %144 = vsyncpa [#allocation4], 1 }

</bundles_post_ra>
